<compile_context>
chip_gen: v7x
topology: tpu7x:2x2x1
jax: 0.10.0
libtpu: 0.0.40
codegen_flags: <defaults>
</compile_context>

<pallas_src>
import jax
import jax.numpy as jnp
from jax.experimental import pallas as pl
from jax.experimental.pallas import tpu as pltpu


def _mps_sweep_kernel(x_ref, a0t_ref, amid_ref, alastt_ref, o_ref):
    """Fused left->right MPS sweep for one lane-dense batch tile.

    x_ref      : (N*d, Bt)            x_ref[i*d + q, a]               = X[i, a, q]
    a0t_ref    : (chi, d)             a0t_ref[b, q]                   = A0[q, b]
    amid_ref   : ((N-1)*d*chi, chi)   amid_ref[i*d*chi + q*chi + c, b] = Amid[i, b, q, c]
    alastt_ref : (l, chi)             alastt_ref[k, b]                = Alast[b, k]
    o_ref      : (l, Bt)              |result|, batch on the lane dim
    """
    chi, d = a0t_ref.shape
    dchi = d * chi
    n_mid = amid_ref.shape[0] // dchi
    cdt = a0t_ref.dtype                     # MXU operand dtype (f32 or bf16)

    # v[b, a] = sum_q A0[q, b] * X[0, a, q]
    v = jnp.dot(a0t_ref[...], x_ref[0:d, :],
                preferred_element_type=jnp.float32)                 # (chi, Bt) f32

    # Statically unrolled sweep over the resident middle cores.
    for i in range(n_mid):
        # One MXU push per core over the bond index b:
        #   U[q*chi + c, a] = sum_b Amid[i, b, q, c] * v[b, a]
        core = amid_ref[i * dchi:(i + 1) * dchi, :]                 # (d*chi, chi) aligned view
        u = jnp.dot(core, v.astype(cdt),
                    preferred_element_type=jnp.float32)             # (d*chi, Bt) f32
        # Post-scale by the physical input and reduce over q (pure f32 VPU; the
        # q-row broadcast (1,Bt)->(chi,Bt) is a cheap sublane broadcast):
        #   v[c, a] = sum_q X[i+1, a, q] * U[q*chi + c, a]
        v_new = None
        for q in range(d):
            row = (i + 1) * d + q
            xq = x_ref[row:row + 1, :]                              # (1, Bt)
            term = xq.astype(jnp.float32) * u[q * chi:(q + 1) * chi, :]
            v_new = term if v_new is None else v_new + term
        v = v_new

    # out[k, a] = | sum_b Alast[b, k] * v[b, a] |
    o_ref[...] = jnp.abs(
        jnp.dot(alastt_ref[...], v.astype(cdt),
                preferred_element_type=jnp.float32)).astype(o_ref.dtype)


def _round_up(x, m):
    return ((x + m - 1) // m) * m


def _tensorcores_per_chip():
    """Best-effort TensorCores-per-chip detection (v7x: 2, v5e/v6e: 1)."""
    try:
        kind = jax.devices()[0].device_kind.lower()
    except Exception:
        return 1
    return 2 if ("v7" in kind or "7x" in kind) else 1


def _choose_batch_tile(B, cap, min_tiles):
    """Lane-dense batch tiling: bt multiple of 128, as large as possible (amortizes
    per-grid-step overhead), while keeping >= min_tiles grid steps so the
    "parallel" batch axis can shard across TensorCores on v7x."""
    b_pad = _round_up(max(B, 1), 128)
    cap = max(128, (cap // 128) * 128)
    target = _round_up(-(-b_pad // max(min_tiles, 1)), 128)
    bt = min(cap, b_pad, target)
    b_pad = _round_up(b_pad, bt)
    return bt, b_pad


def simple_mps_forward_planar(x_planar, a0, amid, alast, *,
                              batch_tile_cap=1024,
                              operand_dtype=jnp.float32):
    """Pallas SimpleMPS forward on pre-laid-out input.

    x_planar: (N*d, B) with x_planar[i*d + q, a] = X[i, a, q]  (lane-dense batch)
    a0: (d, chi)   amid: (N-1, chi, d, chi)   alast: (chi, l)
    returns (B, l) = |MPS contraction|  (float32)
    """
    nd, B = x_planar.shape
    d, chi = a0.shape
    assert nd % d == 0
    N = nd // d
    l = alast.shape[1]
    assert N >= 2, "need at least one middle core"
    assert amid.shape == (N - 1, chi, d, chi)
    assert alast.shape == (chi, l)
    assert chi % 8 == 0, "bond dim must be sublane-aligned (multiple of 8)"

    min_tiles = _tensorcores_per_chip()
    bt, b_pad = _choose_batch_tile(B, batch_tile_cap, min_tiles)

    cdt = operand_dtype
    x_p = x_planar.astype(cdt)
    if b_pad != B:
        x_p = jnp.pad(x_p, ((0, 0), (0, b_pad - B)))

    # Tiny one-off parameter relayouts (layout plumbing, not compute).
    a0_t = a0.T.astype(cdt)                                        # (chi, d)
    # amid_big[i*d*chi + q*chi + c, b] = Amid[i, b, q, c]  -> single dense VMEM tile
    amid_big = jnp.transpose(amid, (0, 2, 3, 1)).reshape(
        (N - 1) * d * chi, chi).astype(cdt)
    alast_t = alast.T.astype(cdt)                                  # (l, chi)

    grid = (b_pad // bt,)
    grid_spec = pltpu.PrefetchScalarGridSpec(
        num_scalar_prefetch=0,
        grid=grid,
        in_specs=[
            pl.BlockSpec((nd, bt), lambda b: (0, b)),              # dense X slab
            pl.BlockSpec((chi, d), lambda b: (0, 0)),              # A0^T (resident)
            pl.BlockSpec(((N - 1) * d * chi, chi), lambda b: (0, 0)),  # all middle cores
            pl.BlockSpec((l, chi), lambda b: (0, 0)),              # Alast^T (resident)
        ],
        out_specs=pl.BlockSpec((l, bt), lambda b: (0, b)),
    )

    out_t = pl.pallas_call(
        _mps_sweep_kernel,
        out_shape=jax.ShapeDtypeStruct((l, b_pad), jnp.float32),
        grid_spec=grid_spec,
        compiler_params=pltpu.CompilerParams(
            dimension_semantics=("parallel",)),   # independent batch tiles (2 TCs on v7x)
    )(x_p, a0_t, amid_big, alast_t)

    return out_t[:, :B].T                                          # (B, l)


def simple_mps_forward(x, a0, amid, alast, *, batch_tile_cap=1024,
                       operand_dtype=jnp.float32):
    """x: (N, B, d) as in the PyTorch module. Returns (B, l) = |MPS contraction|.

    The (N, B, d) -> (N*d, B) relayout is a plain XLA op here; for large B, build X
    directly in (N*d, B) layout and call simple_mps_forward_planar to avoid the
    extra HBM read+write of X.  # TODO(synk): fuse this relayout into the producer.
    """
    N, B, d = x.shape
    x_planar = jnp.transpose(x, (0, 2, 1)).reshape(N * d, B)
    return simple_mps_forward_planar(x_planar, a0, amid, alast,
                                     batch_tile_cap=batch_tile_cap,
                                     operand_dtype=operand_dtype)


def init_simple_mps_params(key, N, chi, d, l, std=1e-3, dtype=jnp.float32):
    """Deterministic init mirroring MPS.initialize_params (identity-ish + noise)."""
    k0, k1, k2 = jax.random.split(key, 3)

    # first core: zeros (d, chi), column 0 set to 1, plus noise
    a0 = jnp.zeros((d, chi), dtype).at[:, 0].set(1.0)
    a0 = a0 + std * jax.random.normal(k0, (d, chi), dtype)

    # middle cores: identity on the bond indices for every physical index, plus noise
    eye = jnp.eye(chi, dtype=dtype)
    amid = jnp.broadcast_to(eye[:, None, :], (chi, d, chi))
    amid = jnp.broadcast_to(amid[None], (N - 1, chi, d, chi))
    amid = amid + std * jax.random.normal(k1, (N - 1, chi, d, chi), dtype)

    # last core: zeros (chi, l), row 0 set to 1, plus noise
    alast = jnp.zeros((chi, l), dtype).at[0, :].set(1.0)
    alast = alast + std * jax.random.normal(k2, (chi, l), dtype)
    return a0, amid, alast


def simple_mps_reference(x, a0, amid, alast):
    """Pure-JAX reference (same math, no Pallas), full-precision matmuls."""
    N = x.shape[0]
    hp = jax.lax.Precision.HIGHEST
    v = jnp.einsum('aq,qb->ab', x[0], a0, precision=hp)
    for i in range(1, N):
        v = jnp.einsum('ab,aq,bqc->ac', v, x[i], amid[i - 1], precision=hp)
    return jnp.abs(jnp.einsum('ab,bl->al', v, alast, precision=hp))


if __name__ == "__main__":
    # SimpleMPS(N=8, chi=8, d=2, l=2); batch=256 (lane-dense tiles, 1 or 2 grid steps).
    N, chi, d, l = 8, 8, 2, 2
    batch = 256

    key = jax.random.PRNGKey(0)
    k_param, k_x = jax.random.split(key)
    a0, amid, alast = init_simple_mps_params(k_param, N, chi, d, l)
    x = jax.random.normal(k_x, (N, batch, d), jnp.float32)

    # f32 MXU operands: bit-for-bit-safe path on all generations.
    out = simple_mps_forward(x, a0, amid, alast)
    out = jax.block_until_ready(out)

    ref = simple_mps_reference(x, a0, amid, alast)
    assert out.shape == (batch, l), out.shape
    assert jnp.allclose(out, ref, atol=1e-5, rtol=5e-4), (out, ref)

    # bf16 MXU operands (v6e/v7x MXU-pass saving; elementwise stays f32 so it is
    # also legal on v5e). Exercised for compile/run coverage; looser accuracy.
    out_bf16 = jax.block_until_ready(
        simple_mps_forward(x, a0, amid, alast, operand_dtype=jnp.bfloat16))
    assert out_bf16.shape == (batch, l)
    assert bool(jnp.all(jnp.isfinite(out_bf16)))

    print("KERNEL_OK")
</pallas_src>

<mosaic_0001>
module attributes {stable_mosaic.version = 11 : i64} {
  func.func @_mps_sweep_kernel(%arg0: i32, %arg1: memref<16x256xf32, #tpu.memory_space<vmem>>, %arg2: memref<8x2xf32, #tpu.memory_space<vmem>>, %arg3: memref<112x8xf32, #tpu.memory_space<vmem>>, %arg4: memref<2x8xf32, #tpu.memory_space<vmem>>, %arg5: memref<2x256xf32, #tpu.memory_space<vmem>>) attributes {dimension_semantics = [#tpu.dimension_semantics<parallel>], iteration_bounds = array<i64: 1>, scalar_prefetch = 0 : i64, scratch_operands = 0 : i64, tpu.core_type = #tpu.core_type<tc>, window_params = [{transform_indices = @transform_0, window_bounds = array<i64: 16, 256>}, {pipeline_mode = #tpu.pipeline_mode<synchronous>, transform_indices = @transform_1, window_bounds = array<i64: 8, 2>}, {pipeline_mode = #tpu.pipeline_mode<synchronous>, transform_indices = @transform_2, window_bounds = array<i64: 112, 8>}, {pipeline_mode = #tpu.pipeline_mode<synchronous>, transform_indices = @transform_3, window_bounds = array<i64: 2, 8>}, {transform_indices = @transform_4, window_bounds = array<i64: 2, 256>}]} {
    %c0 = arith.constant 0 : index
    %c0_0 = arith.constant 0 : index
    %0 = vector.load %arg2[%c0, %c0_0] : memref<8x2xf32, #tpu.memory_space<vmem>>, vector<8x2xf32>
    %c0_1 = arith.constant 0 : index
    %c0_2 = arith.constant 0 : index
    %1 = vector.load %arg1[%c0_1, %c0_2] : memref<16x256xf32, #tpu.memory_space<vmem>>, vector<2x256xf32>
    %cst = arith.constant dense<0.000000e+00> : vector<8x256xf32>
    %2 = tpu.matmul %0, %1, %cst {dimension_numbers = #tpu.dot_dimension_numbers<[1], [0], [0], [1], [0, 0, 1, 1], [], []>} : vector<8x2xf32>, vector<2x256xf32>, vector<8x256xf32> -> vector<8x256xf32>
    %c0_3 = arith.constant 0 : index
    %c0_4 = arith.constant 0 : index
    %3 = vector.load %arg3[%c0_3, %c0_4] : memref<112x8xf32, #tpu.memory_space<vmem>>, vector<16x8xf32>
    %cst_5 = arith.constant dense<0.000000e+00> : vector<16x256xf32>
    %4 = tpu.matmul %3, %2, %cst_5 {dimension_numbers = #tpu.dot_dimension_numbers<[1], [0], [0], [1], [0, 0, 1, 1], [], []>} : vector<16x8xf32>, vector<8x256xf32>, vector<16x256xf32> -> vector<16x256xf32>
    %c2 = arith.constant 2 : index
    %c0_6 = arith.constant 0 : index
    %5 = vector.load %arg1[%c2, %c0_6] : memref<16x256xf32, #tpu.memory_space<vmem>>, vector<1x256xf32>
    %6 = vector.extract_strided_slice %4 {offsets = [0, 0], sizes = [8, 256], strides = [1, 1]} : vector<16x256xf32> to vector<8x256xf32>
    %7 = vector.broadcast %5 : vector<1x256xf32> to vector<8x256xf32>
    %8 = arith.mulf %7, %6 : vector<8x256xf32>
    %c3 = arith.constant 3 : index
    %c0_7 = arith.constant 0 : index
    %9 = vector.load %arg1[%c3, %c0_7] : memref<16x256xf32, #tpu.memory_space<vmem>>, vector<1x256xf32>
    %10 = vector.extract_strided_slice %4 {offsets = [8, 0], sizes = [8, 256], strides = [1, 1]} : vector<16x256xf32> to vector<8x256xf32>
    %11 = vector.broadcast %9 : vector<1x256xf32> to vector<8x256xf32>
    %12 = arith.mulf %11, %10 : vector<8x256xf32>
    %13 = arith.addf %8, %12 : vector<8x256xf32>
    %c16 = arith.constant 16 : index
    %c0_8 = arith.constant 0 : index
    %14 = vector.load %arg3[%c16, %c0_8] : memref<112x8xf32, #tpu.memory_space<vmem>>, vector<16x8xf32>
    %cst_9 = arith.constant dense<0.000000e+00> : vector<16x256xf32>
    %15 = tpu.matmul %14, %13, %cst_9 {dimension_numbers = #tpu.dot_dimension_numbers<[1], [0], [0], [1], [0, 0, 1, 1], [], []>} : vector<16x8xf32>, vector<8x256xf32>, vector<16x256xf32> -> vector<16x256xf32>
    %c4 = arith.constant 4 : index
    %c0_10 = arith.constant 0 : index
    %16 = vector.load %arg1[%c4, %c0_10] : memref<16x256xf32, #tpu.memory_space<vmem>>, vector<1x256xf32>
    %17 = vector.extract_strided_slice %15 {offsets = [0, 0], sizes = [8, 256], strides = [1, 1]} : vector<16x256xf32> to vector<8x256xf32>
    %18 = vector.broadcast %16 : vector<1x256xf32> to vector<8x256xf32>
    %19 = arith.mulf %18, %17 : vector<8x256xf32>
    %c5 = arith.constant 5 : index
    %c0_11 = arith.constant 0 : index
    %20 = vector.load %arg1[%c5, %c0_11] : memref<16x256xf32, #tpu.memory_space<vmem>>, vector<1x256xf32>
    %21 = vector.extract_strided_slice %15 {offsets = [8, 0], sizes = [8, 256], strides = [1, 1]} : vector<16x256xf32> to vector<8x256xf32>
    %22 = vector.broadcast %20 : vector<1x256xf32> to vector<8x256xf32>
    %23 = arith.mulf %22, %21 : vector<8x256xf32>
    %24 = arith.addf %19, %23 : vector<8x256xf32>
    %c32 = arith.constant 32 : index
    %c0_12 = arith.constant 0 : index
    %25 = vector.load %arg3[%c32, %c0_12] : memref<112x8xf32, #tpu.memory_space<vmem>>, vector<16x8xf32>
    %cst_13 = arith.constant dense<0.000000e+00> : vector<16x256xf32>
    %26 = tpu.matmul %25, %24, %cst_13 {dimension_numbers = #tpu.dot_dimension_numbers<[1], [0], [0], [1], [0, 0, 1, 1], [], []>} : vector<16x8xf32>, vector<8x256xf32>, vector<16x256xf32> -> vector<16x256xf32>
    %c6 = arith.constant 6 : index
    %c0_14 = arith.constant 0 : index
    %27 = vector.load %arg1[%c6, %c0_14] : memref<16x256xf32, #tpu.memory_space<vmem>>, vector<1x256xf32>
    %28 = vector.extract_strided_slice %26 {offsets = [0, 0], sizes = [8, 256], strides = [1, 1]} : vector<16x256xf32> to vector<8x256xf32>
    %29 = vector.broadcast %27 : vector<1x256xf32> to vector<8x256xf32>
    %30 = arith.mulf %29, %28 : vector<8x256xf32>
    %c7 = arith.constant 7 : index
    %c0_15 = arith.constant 0 : index
    %31 = vector.load %arg1[%c7, %c0_15] : memref<16x256xf32, #tpu.memory_space<vmem>>, vector<1x256xf32>
    %32 = vector.extract_strided_slice %26 {offsets = [8, 0], sizes = [8, 256], strides = [1, 1]} : vector<16x256xf32> to vector<8x256xf32>
    %33 = vector.broadcast %31 : vector<1x256xf32> to vector<8x256xf32>
    %34 = arith.mulf %33, %32 : vector<8x256xf32>
    %35 = arith.addf %30, %34 : vector<8x256xf32>
    %c48 = arith.constant 48 : index
    %c0_16 = arith.constant 0 : index
    %36 = vector.load %arg3[%c48, %c0_16] : memref<112x8xf32, #tpu.memory_space<vmem>>, vector<16x8xf32>
    %cst_17 = arith.constant dense<0.000000e+00> : vector<16x256xf32>
    %37 = tpu.matmul %36, %35, %cst_17 {dimension_numbers = #tpu.dot_dimension_numbers<[1], [0], [0], [1], [0, 0, 1, 1], [], []>} : vector<16x8xf32>, vector<8x256xf32>, vector<16x256xf32> -> vector<16x256xf32>
    %c8 = arith.constant 8 : index
    %c0_18 = arith.constant 0 : index
    %38 = vector.load %arg1[%c8, %c0_18] : memref<16x256xf32, #tpu.memory_space<vmem>>, vector<1x256xf32>
    %39 = vector.extract_strided_slice %37 {offsets = [0, 0], sizes = [8, 256], strides = [1, 1]} : vector<16x256xf32> to vector<8x256xf32>
    %40 = vector.broadcast %38 : vector<1x256xf32> to vector<8x256xf32>
    %41 = arith.mulf %40, %39 : vector<8x256xf32>
    %c9 = arith.constant 9 : index
    %c0_19 = arith.constant 0 : index
    %42 = vector.load %arg1[%c9, %c0_19] : memref<16x256xf32, #tpu.memory_space<vmem>>, vector<1x256xf32>
    %43 = vector.extract_strided_slice %37 {offsets = [8, 0], sizes = [8, 256], strides = [1, 1]} : vector<16x256xf32> to vector<8x256xf32>
    %44 = vector.broadcast %42 : vector<1x256xf32> to vector<8x256xf32>
    %45 = arith.mulf %44, %43 : vector<8x256xf32>
    %46 = arith.addf %41, %45 : vector<8x256xf32>
    %c64 = arith.constant 64 : index
    %c0_20 = arith.constant 0 : index
    %47 = vector.load %arg3[%c64, %c0_20] : memref<112x8xf32, #tpu.memory_space<vmem>>, vector<16x8xf32>
    %cst_21 = arith.constant dense<0.000000e+00> : vector<16x256xf32>
    %48 = tpu.matmul %47, %46, %cst_21 {dimension_numbers = #tpu.dot_dimension_numbers<[1], [0], [0], [1], [0, 0, 1, 1], [], []>} : vector<16x8xf32>, vector<8x256xf32>, vector<16x256xf32> -> vector<16x256xf32>
    %c10 = arith.constant 10 : index
    %c0_22 = arith.constant 0 : index
    %49 = vector.load %arg1[%c10, %c0_22] : memref<16x256xf32, #tpu.memory_space<vmem>>, vector<1x256xf32>
    %50 = vector.extract_strided_slice %48 {offsets = [0, 0], sizes = [8, 256], strides = [1, 1]} : vector<16x256xf32> to vector<8x256xf32>
    %51 = vector.broadcast %49 : vector<1x256xf32> to vector<8x256xf32>
    %52 = arith.mulf %51, %50 : vector<8x256xf32>
    %c11 = arith.constant 11 : index
    %c0_23 = arith.constant 0 : index
    %53 = vector.load %arg1[%c11, %c0_23] : memref<16x256xf32, #tpu.memory_space<vmem>>, vector<1x256xf32>
    %54 = vector.extract_strided_slice %48 {offsets = [8, 0], sizes = [8, 256], strides = [1, 1]} : vector<16x256xf32> to vector<8x256xf32>
    %55 = vector.broadcast %53 : vector<1x256xf32> to vector<8x256xf32>
    %56 = arith.mulf %55, %54 : vector<8x256xf32>
    %57 = arith.addf %52, %56 : vector<8x256xf32>
    %c80 = arith.constant 80 : index
    %c0_24 = arith.constant 0 : index
    %58 = vector.load %arg3[%c80, %c0_24] : memref<112x8xf32, #tpu.memory_space<vmem>>, vector<16x8xf32>
    %cst_25 = arith.constant dense<0.000000e+00> : vector<16x256xf32>
    %59 = tpu.matmul %58, %57, %cst_25 {dimension_numbers = #tpu.dot_dimension_numbers<[1], [0], [0], [1], [0, 0, 1, 1], [], []>} : vector<16x8xf32>, vector<8x256xf32>, vector<16x256xf32> -> vector<16x256xf32>
    %c12 = arith.constant 12 : index
    %c0_26 = arith.constant 0 : index
    %60 = vector.load %arg1[%c12, %c0_26] : memref<16x256xf32, #tpu.memory_space<vmem>>, vector<1x256xf32>
    %61 = vector.extract_strided_slice %59 {offsets = [0, 0], sizes = [8, 256], strides = [1, 1]} : vector<16x256xf32> to vector<8x256xf32>
    %62 = vector.broadcast %60 : vector<1x256xf32> to vector<8x256xf32>
    %63 = arith.mulf %62, %61 : vector<8x256xf32>
    %c13 = arith.constant 13 : index
    %c0_27 = arith.constant 0 : index
    %64 = vector.load %arg1[%c13, %c0_27] : memref<16x256xf32, #tpu.memory_space<vmem>>, vector<1x256xf32>
    %65 = vector.extract_strided_slice %59 {offsets = [8, 0], sizes = [8, 256], strides = [1, 1]} : vector<16x256xf32> to vector<8x256xf32>
    %66 = vector.broadcast %64 : vector<1x256xf32> to vector<8x256xf32>
    %67 = arith.mulf %66, %65 : vector<8x256xf32>
    %68 = arith.addf %63, %67 : vector<8x256xf32>
    %c96 = arith.constant 96 : index
    %c0_28 = arith.constant 0 : index
    %69 = vector.load %arg3[%c96, %c0_28] : memref<112x8xf32, #tpu.memory_space<vmem>>, vector<16x8xf32>
    %cst_29 = arith.constant dense<0.000000e+00> : vector<16x256xf32>
    %70 = tpu.matmul %69, %68, %cst_29 {dimension_numbers = #tpu.dot_dimension_numbers<[1], [0], [0], [1], [0, 0, 1, 1], [], []>} : vector<16x8xf32>, vector<8x256xf32>, vector<16x256xf32> -> vector<16x256xf32>
    %c14 = arith.constant 14 : index
    %c0_30 = arith.constant 0 : index
    %71 = vector.load %arg1[%c14, %c0_30] : memref<16x256xf32, #tpu.memory_space<vmem>>, vector<1x256xf32>
    %72 = vector.extract_strided_slice %70 {offsets = [0, 0], sizes = [8, 256], strides = [1, 1]} : vector<16x256xf32> to vector<8x256xf32>
    %73 = vector.broadcast %71 : vector<1x256xf32> to vector<8x256xf32>
    %74 = arith.mulf %73, %72 : vector<8x256xf32>
    %c15 = arith.constant 15 : index
    %c0_31 = arith.constant 0 : index
    %75 = vector.load %arg1[%c15, %c0_31] : memref<16x256xf32, #tpu.memory_space<vmem>>, vector<1x256xf32>
    %76 = vector.extract_strided_slice %70 {offsets = [8, 0], sizes = [8, 256], strides = [1, 1]} : vector<16x256xf32> to vector<8x256xf32>
    %77 = vector.broadcast %75 : vector<1x256xf32> to vector<8x256xf32>
    %78 = arith.mulf %77, %76 : vector<8x256xf32>
    %79 = arith.addf %74, %78 : vector<8x256xf32>
    %c0_32 = arith.constant 0 : index
    %c0_33 = arith.constant 0 : index
    %80 = vector.load %arg4[%c0_32, %c0_33] : memref<2x8xf32, #tpu.memory_space<vmem>>, vector<2x8xf32>
    %cst_34 = arith.constant dense<0.000000e+00> : vector<2x256xf32>
    %81 = tpu.matmul %80, %79, %cst_34 {dimension_numbers = #tpu.dot_dimension_numbers<[1], [0], [0], [1], [0, 0, 1, 1], [], []>} : vector<2x8xf32>, vector<8x256xf32>, vector<2x256xf32> -> vector<2x256xf32>
    %82 = math.absf %81 : vector<2x256xf32>
    %c0_35 = arith.constant 0 : index
    %c0_36 = arith.constant 0 : index
    %83 = vector.load %arg5[%c0_35, %c0_36] : memref<2x256xf32, #tpu.memory_space<vmem>>, vector<2x256xf32>
    tpu.vector_store %arg5[%c0_35, %c0_36], %82 {strides = array<i32>} : memref<2x256xf32, #tpu.memory_space<vmem>>, vector<2x256xf32>,
    return
  }
  func.func @transform_0(%arg0: i32) -> (i32, i32) {
    %c0_i32 = arith.constant 0 : i32
    %c0_i32_0 = arith.constant 0 : i32
    return %c0_i32, %arg0 : i32, i32
  }
  func.func @transform_1(%arg0: i32) -> (i32, i32) {
    %c0_i32 = arith.constant 0 : i32
    %c0_i32_0 = arith.constant 0 : i32
    %c0_i32_1 = arith.constant 0 : i32
    return %c0_i32, %c0_i32_0 : i32, i32
  }
  func.func @transform_2(%arg0: i32) -> (i32, i32) {
    %c0_i32 = arith.constant 0 : i32
    %c0_i32_0 = arith.constant 0 : i32
    %c0_i32_1 = arith.constant 0 : i32
    return %c0_i32, %c0_i32_0 : i32, i32
  }
  func.func @transform_3(%arg0: i32) -> (i32, i32) {
    %c0_i32 = arith.constant 0 : i32
    %c0_i32_0 = arith.constant 0 : i32
    %c0_i32_1 = arith.constant 0 : i32
    return %c0_i32, %c0_i32_0 : i32, i32
  }
  func.func @transform_4(%arg0: i32) -> (i32, i32) {
    %c0_i32 = arith.constant 0 : i32
    %c0_i32_0 = arith.constant 0 : i32
    return %c0_i32, %arg0 : i32, i32
  }
}

</mosaic_0001>

<bundles_post_ra>
// kernel: tpu_custom_call.1
= control target key start
LH: loop header
LB: loop body
LE: loop exit
PB: predicated region body
PF: predicated region fallthrough
CT: control target
= control target key end

     0   :  { %vm25_vm0 = vcmask 1041408   ;;  %v1085_v2 = vmov 0.0   ;;  %vm21_vm1 = vcmask 15360   ;;  %s1283_s0 = inlined_call_operand.vmem [shape: f32[16,256], index: 0, kind: input, shape index: {}]   ;;  %s1284_s1 = inlined_call_operand.vmem [shape: f32[8,2], index: 1, kind: input, shape index: {}]   ;;  %s1285_s2 = inlined_call_operand.vmem [shape: f32[112,8], index: 2, kind: input, shape index: {}]   ;;  %s1286_s3 = inlined_call_operand.vmem [shape: f32[2,8], index: 3, kind: input, shape index: {}]   ;;  %s1287_s4 = inlined_call_operand.hbm [shape: f32[2,256], index: 4, kind: output, shape index: {}]  }
   0x1   :  { %v20_v0 = vld [vmem:[%s1283_s0 + $0x8] sm:$0x3]  ;;  %v19_v1 = vld [vmem:[%s1283_s0] sm:$0x3]  ;;  %96 = vmatprep.mubr.f32.mxu0 %v1085_v2 }
   0x2   :  { %1026 = vmatprep.subr.msk.mxu0 %vm25_vm0, %v20_v0  ;;  %v18_v3 = vld [vmem:[%s1284_s1] sm:$0xff] }
   0x3   :  { %9 = vsyncpa [#allocation3], 0  ;;  %1027 = vmatpush1.msk.msra.mxu0 %vm25_vm0, %v19_v1  ;;  %176 = vmatprep.mubr.f32.mxu1 %v1085_v2  ;;  %v103_v6 = vld [vmem:[%s1285_s2] sm:$0xff]  ;;  %vm105_vm2 = vcmask 64512   ;;  %v104_v7 = vld [vmem:[%s1285_s2 + $0x8] sm:$0xff]  ;;  %v192_v8 = vlaneseq  ;;  %s1086_s1 = smov [#allocation2]  }
   0x4   :  { %1028 = vmatmul.mubr.msk.f32.vlgmr.msra.gmra.mrb[0].mxu0 %vm21_vm1, %v18_v3  ;;  %v1031_v10 = vld [vmem:[%s1283_s0 + $0x2] ss:$8 sm:$0x3]  ;;  %v1032_v13 = vld [vmem:[%s1283_s0 + $0x3] ss:$8 sm:$0x3] }
   0x5   :  { %293 = vmatprep.mubr.f32.mxu0 %v1085_v2  ;;  %v193_v9 = vshrl.u32 %v192_v8, 7  ;;  %v221_v28 = vld [vmem:[%s1285_s2 + $0x10] sm:$0xff]  ;;  %v222_v29 = vld [vmem:[%s1285_s2 + $0x18] sm:$0xff]  ;;  %v1035_v30 = vld [vmem:[%s1283_s0 + $0x4] ss:$8 sm:$0x3] }
   0x6   :  { %v1036_v31 = vld [vmem:[%s1283_s0 + $0x5] ss:$8 sm:$0x3]  ;;  %v1039_v48 = vld [vmem:[%s1283_s0 + $0x6] ss:$8 sm:$0x3] }
   0x7   :  { %v1137_v11 = vsub.s32 0, %v193_v9  ;;  %v1139_v12 = vsub.s32 1, %v193_v9  ;;  %v338_v46 = vld [vmem:[%s1285_s2 + $0x20] sm:$0xff]  ;;  %v339_v47 = vld [vmem:[%s1285_s2 + $0x28] sm:$0xff]  ;;  %v455_v0 = vld [vmem:[%s1285_s2 + $0x30] sm:$0xff]  ;;  %s1018_s23 = sshll.u32 %s1086_s1, 4  ;;  %s1019_s23 = int_to_ptr.vmem [resolvable:$true] %s1018_s23 }
   0x8   :  { %v1040_v49 = vld [vmem:[%s1283_s0 + $0x7] ss:$8 sm:$0x3]  ;;  %v456_v1 = vld [vmem:[%s1285_s2 + $0x38] sm:$0xff]  ;;  %s1061_s24 = scalar_lea.vmem %s1019_s23, 64  ;;  %p1066_p1 = scmp.lt.s32.totalorder %s1019_s23, %s1019_s23 }
   0x9   :  { %v195_v15 = vrot.slane %v1031_v10, %v1137_v11  ;;  %v210_v17 = vrot.slane %v1032_v13, %v1137_v11  ;;  %v199_v18 = vrot.slane %v1031_v10, %v1139_v12  ;;  %v214_v19 = vrot.slane %v1032_v13, %v1139_v12  ;;  %v1043_v3 = vld [vmem:[%s1283_s0 + $0x10] ss:$8 sm:$0x3]  ;;  %p1062_p0 = scmp.ne.s32.totalorder %s1019_s23, %s1061_s24  ;;  %p1067_p2 = scmp.lt.s32.totalorder %s1061_s24, %s1061_s24 }
   0xa   :  { %v312_v33 = vrot.slane %v1035_v30, %v1137_v11  ;;  %v327_v35 = vrot.slane %v1036_v31, %v1137_v11  ;;  %v316_v36 = vrot.slane %v1035_v30, %v1139_v12  ;;  %v331_v37 = vrot.slane %v1036_v31, %v1139_v12 }
   0xb   :  { %v429_v51 = vrot.slane %v1039_v48, %v1137_v11  ;;  %v444_v53 = vrot.slane %v1040_v49, %v1137_v11  ;;  %v433_v54 = vrot.slane %v1039_v48, %v1139_v12  ;;  %v448_v55 = vrot.slane %v1040_v49, %v1139_v12  ;;  %p1068_p3 = por %p1067_p2, %p1066_p1 }
   0xc   :  { %v550_v9 = vrot.slane %v1043_v3, %v1139_v12 }
   0xd   :  { %p1069_p4 = pnand %p1068_p3, %p1062_p0 }
  0xd7   :  { %v98_v4 = vpop.f32.mrb[0].mxu0 }
  0xd8   :  { %v100_v5 = vpop.f32.mrb[1].mxu0 }
  0xd9   :  { %112 = vmatprep.subr.mxu1 %v100_v5 }
  0xda   :  { %113 = vmatpush1.msra.mxu1 %v98_v4  ;;  %v1044_v4 = vld [vmem:[%s1283_s0 + $0x11] ss:$8 sm:$0x3] }
  0xdb   :  { %1029 = vmatmul.mubr.msk.f32.vlgmr.msra.gmra.mrb[0].mxu1 %vm105_vm2, %v103_v6  ;;  %v546_v6 = vrot.slane %v1043_v3, %v1137_v11  ;;  %v561_v8 = vrot.slane %v1044_v4, %v1137_v11  ;;  %v565_v10 = vrot.slane %v1044_v4, %v1139_v12 }
  0xdc   :  { %182 = vmatprep.mubr.f32.mxu1 %v1085_v2 }
  0xdf   :  { %1030 = vmatmul.mubr.msk.f32.gmra.mrb[2].mxu1 %vm105_vm2, %v104_v7 }
  0xe0   :  { %410 = vmatprep.mubr.f32.mxu1 %v1085_v2 }
 0x1ae   :  { %v178_v14 = vpop.f32.mrb[0].mxu1 }
 0x1af   :  { %v180_v16 = vpop.f32.mrb[1].mxu1  ;;  %v202_v21 = vmul.f32 %v195_v15, %v178_v14 }
 0x1b0   :  { %v203_v24 = vmul.f32 %v199_v18, %v180_v16 }
 0x1b2   :  { %v184_v20 = vpop.f32.mrb[2].mxu1 }
 0x1b3   :  { %v217_v22 = vmul.f32 %v210_v17, %v184_v20  ;;  %v186_v23 = vpop.f32.mrb[3].mxu1 }
 0x1b4   :  { %v218_v25 = vmul.f32 %v214_v19, %v186_v23  ;;  %v1047_v23 = vld [vmem:[%s1283_s0 + $0x12] ss:$8 sm:$0x3] }
 0x1b5   :  { %v219_v26 = vadd.f32 %v217_v22, %v202_v21  ;;  %v572_v21 = vld [vmem:[%s1285_s2 + $0x40] sm:$0xff]  ;;  %v573_v22 = vld [vmem:[%s1285_s2 + $0x48] sm:$0xff] }
 0x1b6   :  { %v220_v27 = vadd.f32 %v218_v25, %v203_v24  ;;  %v1048_v24 = vld [vmem:[%s1283_s0 + $0x13] ss:$8 sm:$0x3] }
 0x1b7   :  { %v682_v30 = vrot.slane %v1048_v24, %v1139_v12 }
 0x1b8   :  { %229 = vmatprep.subr.mxu0 %v220_v27 }
 0x1b9   :  { %230 = vmatpush1.msra.mxu0 %v219_v26  ;;  %v663_v26 = vrot.slane %v1047_v23, %v1137_v11 }
 0x1ba   :  { %1033 = vmatmul.mubr.msk.f32.vlgmr.msra.gmra.mrb[2].mxu0 %vm105_vm2, %v221_v28  ;;  %v678_v28 = vrot.slane %v1048_v24, %v1137_v11 }
 0x1bb   :  { %299 = vmatprep.mubr.f32.mxu0 %v1085_v2 }
 0x1be   :  { %1034 = vmatmul.mubr.msk.f32.gmra.mrb[4].mxu0 %vm105_vm2, %v222_v29  ;;  %v667_v29 = vrot.slane %v1047_v23, %v1139_v12 }
 0x1bf   :  { %527 = vmatprep.mubr.f32.mxu0 %v1085_v2 }
 0x28d   :  { %v295_v32 = vpop.f32.mrb[2].mxu0 }
 0x28e   :  { %v297_v34 = vpop.f32.mrb[3].mxu0  ;;  %v319_v39 = vmul.f32 %v312_v33, %v295_v32 }
 0x28f   :  { %v320_v42 = vmul.f32 %v316_v36, %v297_v34 }
 0x291   :  { %v301_v38 = vpop.f32.mrb[4].mxu0 }
 0x292   :  { %v334_v40 = vmul.f32 %v327_v35, %v301_v38  ;;  %v303_v41 = vpop.f32.mrb[5].mxu0 }
 0x293   :  { %v335_v43 = vmul.f32 %v331_v37, %v303_v41  ;;  %v1051_v41 = vld [vmem:[%s1283_s0 + $0x14] ss:$8 sm:$0x3] }
 0x294   :  { %v336_v44 = vadd.f32 %v334_v40, %v319_v39  ;;  %v689_v39 = vld [vmem:[%s1285_s2 + $0x50] sm:$0xff]  ;;  %v690_v40 = vld [vmem:[%s1285_s2 + $0x58] sm:$0xff] }
 0x295   :  { %v337_v45 = vadd.f32 %v335_v43, %v320_v42  ;;  %v1052_v42 = vld [vmem:[%s1283_s0 + $0x15] ss:$8 sm:$0x3] }
 0x296   :  { %v799_v48 = vrot.slane %v1052_v42, %v1139_v12 }
 0x297   :  { %346 = vmatprep.subr.mxu1 %v337_v45 }
 0x298   :  { %347 = vmatpush1.msra.mxu1 %v336_v44  ;;  %v780_v44 = vrot.slane %v1051_v41, %v1137_v11 }
 0x299   :  { %1037 = vmatmul.mubr.msk.f32.vlgmr.msra.gmra.mrb[4].mxu1 %vm105_vm2, %v338_v46  ;;  %v795_v46 = vrot.slane %v1052_v42, %v1137_v11 }
 0x29a   :  { %416 = vmatprep.mubr.f32.mxu1 %v1085_v2 }
 0x29d   :  { %1038 = vmatmul.mubr.msk.f32.gmra.mrb[6].mxu1 %vm105_vm2, %v339_v47  ;;  %v784_v47 = vrot.slane %v1051_v41, %v1139_v12 }
 0x29e   :  { %644 = vmatprep.mubr.f32.mxu1 %v1085_v2 }
 0x36c   :  { %v412_v50 = vpop.f32.mrb[4].mxu1 }
 0x36d   :  { %v414_v52 = vpop.f32.mrb[5].mxu1  ;;  %v436_v57 = vmul.f32 %v429_v51, %v412_v50 }
 0x36e   :  { %v437_v60 = vmul.f32 %v433_v54, %v414_v52 }
 0x370   :  { %v418_v56 = vpop.f32.mrb[6].mxu1 }
 0x371   :  { %v451_v58 = vmul.f32 %v444_v53, %v418_v56  ;;  %v420_v59 = vpop.f32.mrb[7].mxu1 }
 0x372   :  { %v452_v61 = vmul.f32 %v448_v55, %v420_v59  ;;  %v1055_v59 = vld [vmem:[%s1283_s0 + $0x16] ss:$8 sm:$0x3] }
 0x373   :  { %v453_v62 = vadd.f32 %v451_v58, %v436_v57  ;;  %v806_v57 = vld [vmem:[%s1285_s2 + $0x60] sm:$0xff]  ;;  %v807_v58 = vld [vmem:[%s1285_s2 + $0x68] sm:$0xff] }
 0x374   :  { %v454_v63 = vadd.f32 %v452_v61, %v437_v60  ;;  %v1056_v60 = vld [vmem:[%s1283_s0 + $0x17] ss:$8 sm:$0x3] }
 0x376   :  { %463 = vmatprep.subr.mxu0 %v454_v63 }
 0x377   :  { %464 = vmatpush1.msra.mxu0 %v453_v62  ;;  %v897_v62 = vrot.slane %v1055_v59, %v1137_v11 }
 0x378   :  { %1041 = vmatmul.mubr.msk.f32.vlgmr.msra.gmra.mrb[6].mxu0 %vm105_vm2, %v455_v0  ;;  %v901_v0 = vrot.slane %v1055_v59, %v1139_v12 }
 0x379   :  { %533 = vmatprep.mubr.f32.mxu0 %v1085_v2 }
 0x37c   :  { %1042 = vmatmul.mubr.msk.f32.gmra.mrb[8].mxu0 %vm105_vm2, %v456_v1  ;;  %v916_v1 = vrot.slane %v1056_v60, %v1139_v12 }
 0x37d   :  { %761 = vmatprep.mubr.f32.mxu0 %v1085_v2 }
 0x44b   :  { %v529_v5 = vpop.f32.mrb[6].mxu0 }
 0x44c   :  { %v531_v7 = vpop.f32.mrb[7].mxu0  ;;  %v553_v14 = vmul.f32 %v546_v6, %v529_v5 }
 0x44d   :  { %v554_v17 = vmul.f32 %v550_v9, %v531_v7 }
 0x44f   :  { %v535_v13 = vpop.f32.mrb[8].mxu0 }
 0x450   :  { %v568_v15 = vmul.f32 %v561_v8, %v535_v13  ;;  %v537_v16 = vpop.f32.mrb[9].mxu0  ;;  %v923_v13 = vld [vmem:[%s1286_s3] sm:$0x3] }
 0x451   :  { %v569_v18 = vmul.f32 %v565_v10, %v537_v16 }
 0x452   :  { %v570_v19 = vadd.f32 %v568_v15, %v553_v14 }
 0x453   :  { %v571_v20 = vadd.f32 %v569_v18, %v554_v17 }
 0x455   :  { %580 = vmatprep.subr.mxu1 %v571_v20 }
 0x456   :  { %581 = vmatpush1.msra.mxu1 %v570_v19 }
 0x457   :  { %1045 = vmatmul.mubr.msk.f32.vlgmr.msra.gmra.mrb[8].mxu1 %vm105_vm2, %v572_v21 }
 0x458   :  { %650 = vmatprep.mubr.f32.mxu1 %v1085_v2 }
 0x45b   :  { %1046 = vmatmul.mubr.msk.f32.gmra.mrb[10].mxu1 %vm105_vm2, %v573_v22 }
 0x45c   :  { %878 = vmatprep.mubr.f32.mxu1 %v1085_v2 }
 0x52a   :  { %v646_v25 = vpop.f32.mrb[8].mxu1 }
 0x52b   :  { %v648_v27 = vpop.f32.mrb[9].mxu1  ;;  %v670_v32 = vmul.f32 %v663_v26, %v646_v25 }
 0x52c   :  { %v671_v35 = vmul.f32 %v667_v29, %v648_v27 }
 0x52e   :  { %v652_v31 = vpop.f32.mrb[10].mxu1 }
 0x52f   :  { %v685_v33 = vmul.f32 %v678_v28, %v652_v31  ;;  %v654_v34 = vpop.f32.mrb[11].mxu1 }
 0x530   :  { %v686_v36 = vmul.f32 %v682_v30, %v654_v34 }
 0x531   :  { %v687_v37 = vadd.f32 %v685_v33, %v670_v32 }
 0x532   :  { %v688_v38 = vadd.f32 %v686_v36, %v671_v35 }
 0x534   :  { %697 = vmatprep.subr.mxu0 %v688_v38 }
 0x535   :  { %698 = vmatpush1.msra.mxu0 %v687_v37 }
 0x536   :  { %1049 = vmatmul.mubr.msk.f32.vlgmr.msra.gmra.mrb[10].mxu0 %vm105_vm2, %v689_v39 }
 0x537   :  { %767 = vmatprep.mubr.f32.mxu0 %v1085_v2 }
 0x53a   :  { %1050 = vmatmul.mubr.msk.f32.gmra.mrb[12].mxu0 %vm105_vm2, %v690_v40 }
 0x53b   :  { %991 = vmatprep.mubr.f32.mxu0 %v1085_v2 }
 0x609   :  { %v763_v43 = vpop.f32.mrb[10].mxu0 }
 0x60a   :  { %v765_v45 = vpop.f32.mrb[11].mxu0  ;;  %v787_v50 = vmul.f32 %v780_v44, %v763_v43 }
 0x60b   :  { %v788_v53 = vmul.f32 %v784_v47, %v765_v45 }
 0x60d   :  { %v769_v49 = vpop.f32.mrb[12].mxu0 }
 0x60e   :  { %v802_v51 = vmul.f32 %v795_v46, %v769_v49  ;;  %v771_v52 = vpop.f32.mrb[13].mxu0 }
 0x60f   :  { %v803_v54 = vmul.f32 %v799_v48, %v771_v52 }
 0x610   :  { %v804_v55 = vadd.f32 %v802_v51, %v787_v50 }
 0x611   :  { %v805_v56 = vadd.f32 %v803_v54, %v788_v53 }
 0x613   :  { %814 = vmatprep.subr.mxu1 %v805_v56 }
 0x614   :  { %815 = vmatpush1.msra.mxu1 %v804_v55 }
 0x615   :  { %1053 = vmatmul.mubr.msk.f32.vlgmr.msra.gmra.mrb[12].mxu1 %vm105_vm2, %v806_v57 }
 0x616   :  { %884 = vmatprep.mubr.f32.mxu1 %v1085_v2  ;;  %v912_v2 = vrot.slane %v1056_v60, %v1137_v11 }
 0x619   :  { %1054 = vmatmul.mubr.msk.f32.gmra.mrb[14].mxu1 %vm105_vm2, %v807_v58 }
 0x6e8   :  { %v880_v61 = vpop.f32.mrb[12].mxu1 }
 0x6e9   :  { %v882_v63 = vpop.f32.mrb[13].mxu1  ;;  %v904_v4 = vmul.f32 %v897_v62, %v880_v61 }
 0x6ea   :  { %v905_v7 = vmul.f32 %v901_v0, %v882_v63 }
 0x6ec   :  { %v886_v3 = vpop.f32.mrb[14].mxu1 }
 0x6ed   :  { %v919_v5 = vmul.f32 %v912_v2, %v886_v3  ;;  %v888_v6 = vpop.f32.mrb[15].mxu1 }
 0x6ee   :  { %v920_v8 = vmul.f32 %v916_v1, %v888_v6 }
 0x6ef   :  { %v921_v9 = vadd.f32 %v919_v5, %v904_v4 }
 0x6f0   :  { %v922_v10 = vadd.f32 %v920_v8, %v905_v7 }
 0x6f2   :  { %927 = vmatprep.subr.mxu0 %v922_v10 }
 0x6f3   :  { %928 = vmatpush1.msra.mxu0 %v921_v9 }
 0x6f4   :  { %1057 = vmatmul.mubr.msk.f32.vlgmr.msra.gmra.mrb[14].mxu0 %vm105_vm2, %v923_v13 }
 0x7c7   :  { %v993_v11 = vpop.f32.mrb[14].mxu0 }
 0x7c8   :  { %v998_v14 = vand.u32 2147483647, %v993_v11  ;;  %v995_v15 = vpop.f32.mrb[15].mxu0 }
 0x7c9   :  { %v999_v12 = vand.u32 2147483647, %v995_v15 }
 0x7cb   :  { %v1002_v16 = vcombine.low %v998_v14, %v999_v12 }
 0x7cd   :  { %1058 = vst.sshfl [vmem:[#allocation2] sm:$0x33 pattern:$0x76325410] %v1002_v16 }
 0x7ce   :  { %1072 = shalt.err (!%p1069_p4)
}
 0x7cf   :  { %s1073_s26 = scalar_lea.hbm %s1287_s4, 64 }
 0x7d0   :  { %p1074_p5 = scmp.ne.s32.totalorder %s1287_s4, %s1073_s26  ;;  %p1077_p6 = scmp.lt.u32.totalorder %s1073_s26, %s1287_s4 }
 0x7d2   :  { %p1079_p7 = pnand %p1077_p6, %p1074_p5 }
 0x7d4   :  { %1082 = shalt.err (!%p1079_p7)
}
 0x7d5   :  { %1021 = dma.vmem_to_hbm [thread:$0]  %s1019_s23, 64, %s1287_s4, [#allocation3]  }
 0x7d6   :  { %1083 = dma.done.wait [#allocation3], 64  }
 0x7d7   :  { %1084 = vsyncadd [#allocation3], 4294967232 }
 0x7d8   :  { %1025 = vsyncpa [#allocation3], 1 }

</bundles_post_ra>
